<compile_context>
chip_gen: v7x
topology: tpu7x:2x2x1
jax: 0.10.0
libtpu: 0.0.40
codegen_flags: <defaults>
</compile_context>

<pallas_src>
import functools

import jax
import jax.numpy as jnp
from jax.experimental import pallas as pl
from jax.experimental.pallas import tpu as pltpu

GCONV1 = 24
GCONV2 = 24
HID_LAYER1 = 40
HID_LAYER2 = 24
WFINAL = 0.003
BN_EPS = 1e-5
LANES = 128


def _align8(x):
    return (x + 7) // 8 * 8


def _slab_layout(state_dim, action_dim):
    off_w1 = 0
    off_wf = _align8(off_w1 + state_dim)           # wfold = wc1 @ w2_g   [H1, H2]
    off_w2a = _align8(off_wf + HID_LAYER1)         # w2_a                 [A, H2]
    off_vec = _align8(off_w2a + action_dim)        # 6 vector rows
    n_rows = _align8(off_vec + 6)
    return dict(w1=off_w1, wfold=off_wf, w2a=off_w2a, vec=off_vec, rows=n_rows)


def _critic_kernel(ip_ref, act_ref, adj_ref, w_ref, q_ref,
                   *, state_dim, action_dim, lay):
    S, A = state_dim, action_dim
    H1, H2 = HID_LAYER1, HID_LAYER2

    ip = ip_ref[0]                                   # [N, S]
    act = act_ref[0]                                 # [N, A]
    adj = adj_ref[0]                                 # [N, N] normalized adjacency

    ow1, owf, ow2a, ov = lay["w1"], lay["wfold"], lay["w2a"], lay["vec"]
    w1 = w_ref[ow1:ow1 + S, 0:H1]                    # [S, H1]
    wfold = w_ref[owf:owf + H1, 0:H2]                # [H1, H2]  = wc1 @ w2_g
    w2a = w_ref[ow2a:ow2a + A, 0:H2]                 # [A, H2]
    b1 = w_ref[ov + 0:ov + 1, 0:H1]                  # [1, H1]
    gamma = w_ref[ov + 1:ov + 2, 0:H1]               # [1, H1]
    beta = w_ref[ov + 2:ov + 3, 0:H1]                # [1, H1]
    b2 = w_ref[ov + 3:ov + 4, 0:H2]                  # [1, H2]  = bc1 @ w2_g + b2
    wvrow = w_ref[ov + 4:ov + 5, 0:H2]               # [1, H2]  = (wc2 @ w3)^T
    cq = w_ref[ov + 5:ov + 6, 0:1]                   # [1, 1]   = bc2 @ w3 + b3

    # fc1 + ReLU
    h1 = jnp.maximum(
        jnp.dot(ip, w1, preferred_element_type=jnp.float32) + b1, 0.0)   # [N, H1]

    # BatchNorm1d (training mode: batch mean / biased variance over nodes),
    # affine folded into a single scale/shift.
    mu = jnp.mean(h1, axis=0, keepdims=True)
    d = h1 - mu
    var = jnp.mean(d * d, axis=0, keepdims=True)
    scale = gamma * jax.lax.rsqrt(var + BN_EPS)
    shift = beta - mu * scale
    h1n = h1 * scale + shift                                              # [N, H1]

    # GraphConv1 fused with the g1-branch of fc2:
    #   g1 @ w2_g = A @ (h1n @ (wc1 @ w2_g)) + bc1 @ w2_g
    t = jnp.dot(h1n, wfold, preferred_element_type=jnp.float32)           # [N, H2]
    h2 = jnp.maximum(
        jnp.dot(adj, t, preferred_element_type=jnp.float32)
        + jnp.dot(act, w2a, preferred_element_type=jnp.float32)
        + b2, 0.0)                                                        # [N, H2]

    # Folded tail: GraphConv2 + dgl.mean_nodes + fc3
    #   q = mean_rows(A) @ h2 @ (wc2 @ w3) + (bc2 @ w3 + b3)
    r = jnp.mean(adj, axis=0, keepdims=True)                              # [1, N]
    rh = jnp.dot(r, h2, preferred_element_type=jnp.float32)               # [1, H2]
    q = jnp.sum(rh * wvrow, axis=1, keepdims=True) + cq                   # [1, 1]

    # lane-dense store (unmasked vst); wrapper reads column 0
    q_ref[0] = jnp.broadcast_to(q, (1, LANES))


def pack_params(params, state_dim, action_dim):
    """Fold the linear tail / fc2 g1-branch and pack everything into one slab."""
    lay = _slab_layout(state_dim, action_dim)
    w2g = params["w2"][:GCONV1, :]                       # [G1, H2]
    w2a = params["w2"][GCONV1:, :]                       # [A, H2]
    wfold = params["wc1"] @ w2g                          # [H1, H2]
    b2fold = params["bc1"] @ w2g + params["b2"]          # [1, H2]
    wv = params["wc2"] @ params["w3"]                    # [H2, 1]
    cq = params["bc2"] @ params["w3"] + params["b3"]     # [1, 1]

    slab = jnp.zeros((lay["rows"], LANES), jnp.float32)
    slab = slab.at[lay["w1"]:lay["w1"] + state_dim, :HID_LAYER1].set(params["w1"])
    slab = slab.at[lay["wfold"]:lay["wfold"] + HID_LAYER1, :HID_LAYER2].set(wfold)
    slab = slab.at[lay["w2a"]:lay["w2a"] + action_dim, :HID_LAYER2].set(w2a)
    v = lay["vec"]
    slab = slab.at[v + 0, :HID_LAYER1].set(params["b1"][0])
    slab = slab.at[v + 1, :HID_LAYER1].set(params["gamma"][0])
    slab = slab.at[v + 2, :HID_LAYER1].set(params["beta"][0])
    slab = slab.at[v + 3, :HID_LAYER2].set(b2fold[0])
    slab = slab.at[v + 4, :HID_LAYER2].set(wv[:, 0])
    slab = slab.at[v + 5, 0].set(cq[0, 0])
    return slab, lay


def critic_forward(ip, action, adj_norm, params):
    """ip:[B,N,S] (or [N,S]), action:[B,N,A], adj_norm:[B,N,N] -> q:[B] (scalar if B==1)."""
    if ip.ndim == 2:
        ip, action, adj_norm = ip[None], action[None], adj_norm[None]
    B, N, S = ip.shape
    A = action.shape[-1]
    slab, lay = pack_params(params, S, A)

    kernel = functools.partial(_critic_kernel, state_dim=S, action_dim=A, lay=lay)
    grid_spec = pltpu.PrefetchScalarGridSpec(
        num_scalar_prefetch=0,
        grid=(B,),
        in_specs=[
            pl.BlockSpec((1, N, S), lambda b: (b, 0, 0)),
            pl.BlockSpec((1, N, A), lambda b: (b, 0, 0)),
            pl.BlockSpec((1, N, N), lambda b: (b, 0, 0)),
            pl.BlockSpec((lay["rows"], LANES), lambda b: (0, 0)),  # weights stay resident
        ],
        out_specs=pl.BlockSpec((1, 1, LANES), lambda b: (b, 0, 0)),
    )
    out = pl.pallas_call(
        kernel,
        out_shape=jax.ShapeDtypeStruct((B, 1, LANES), jnp.float32),
        grid_spec=grid_spec,
        compiler_params=pltpu.CompilerParams(
            dimension_semantics=("parallel",)),   # megacore sharding on v7x
    )(ip, action, adj_norm, slab)
    return jnp.squeeze(out[:, 0, 0])              # matches Qval.squeeze()


# ---------------------------------------------------------------------------
# parameter construction (torch-equivalent layouts, transposed to [in, out])
# ---------------------------------------------------------------------------
def fanin_uniform(key, shape, fanin):
    w = 1.0 / jnp.sqrt(jnp.float32(fanin))
    return jax.random.uniform(key, shape, jnp.float32, -w, w)


def make_params(key, state_dim, action_dim):
    ks = jax.random.split(key, 10)
    p = {}
    # fc1: torch weight (HID_LAYER1, stateDim), fanin_init fanin=size[0]
    p["w1"] = fanin_uniform(ks[0], (HID_LAYER1, state_dim), HID_LAYER1).T     # [S, 40]
    p["b1"] = fanin_uniform(ks[1], (1, HID_LAYER1), state_dim)
    # bn1 affine (default init)
    p["gamma"] = jnp.ones((1, HID_LAYER1), jnp.float32)
    p["beta"] = jnp.zeros((1, HID_LAYER1), jnp.float32)
    # conv1: DGL GraphConv weight (in, out), bias zeros
    p["wc1"] = fanin_uniform(ks[2], (HID_LAYER1, GCONV1), HID_LAYER1)
    p["bc1"] = jnp.zeros((1, GCONV1), jnp.float32)
    # fc2: torch weight (HID_LAYER2, GCONV1+actionDim)
    p["w2"] = fanin_uniform(ks[3], (HID_LAYER2, GCONV1 + action_dim), HID_LAYER2).T  # [28, 24]
    p["b2"] = fanin_uniform(ks[4], (1, HID_LAYER2), GCONV1 + action_dim)
    # conv2
    p["wc2"] = fanin_uniform(ks[5], (HID_LAYER2, GCONV2), HID_LAYER2)
    p["bc2"] = jnp.zeros((1, GCONV2), jnp.float32)
    # fc3
    p["w3"] = jax.random.uniform(ks[6], (1, GCONV2), jnp.float32, -WFINAL, WFINAL).T  # [24, 1]
    p["b3"] = jax.random.uniform(ks[7], (1, 1), jnp.float32,
                                 -1.0 / jnp.sqrt(jnp.float32(GCONV2)),
                                 1.0 / jnp.sqrt(jnp.float32(GCONV2)))
    return p


def both_normalized_adjacency(adj):
    # adj[i, j] == 1.0 iff there is an edge j -> i (rows = dst, cols = src)
    in_deg = jnp.clip(jnp.sum(adj, axis=1), 1.0, None)
    out_deg = jnp.clip(jnp.sum(adj, axis=0), 1.0, None)
    return (adj / jnp.sqrt(in_deg)[:, None]) / jnp.sqrt(out_deg)[None, :]


def critic_reference(ip, action, adj_norm, params):
    """Unfused pure-JAX reference of the original module (per-graph)."""
    def one(ipb, actb, adjb):
        h1 = jnp.maximum(ipb @ params["w1"] + params["b1"], 0.0)
        mu = jnp.mean(h1, axis=0, keepdims=True)
        var = jnp.mean((h1 - mu) ** 2, axis=0, keepdims=True)
        h1n = (h1 - mu) / jnp.sqrt(var + BN_EPS) * params["gamma"] + params["beta"]
        g1 = adjb @ (h1n @ params["wc1"]) + params["bc1"]
        x2 = jnp.concatenate([g1, actb], axis=1)
        h2 = jnp.maximum(x2 @ params["w2"] + params["b2"], 0.0)
        g2 = adjb @ (h2 @ params["wc2"]) + params["bc2"]
        gall = jnp.mean(g2, axis=0, keepdims=True)
        return (gall @ params["w3"] + params["b3"])[0, 0]
    return jax.vmap(one)(ip, action, adj_norm)


if __name__ == "__main__":
    key = jax.random.PRNGKey(0)
    k_feat, k_act, k_adj, k_par = jax.random.split(key, 4)

    B = 4                              # batch of independent graphs per launch
    n_nodes = 8
    delay_dim, res_dim = 8, 8          # N_DELAY and N node features
    state_dim = delay_dim + res_dim    # 16
    action_dim = 4

    # graph node data and per-node action for each graph
    n_delay = jax.random.normal(k_feat, (B, n_nodes, delay_dim), jnp.float32)
    n_res = jax.random.normal(jax.random.fold_in(k_feat, 1),
                              (B, n_nodes, res_dim), jnp.float32)
    ip = jnp.concatenate([n_delay, n_res], axis=-1)      # torch.cat([ip, ipres], dim=1)
    action = jax.random.normal(k_act, (B, n_nodes, action_dim), jnp.float32)

    # random directed adjacency (with self loops), then both-normalize
    adj = (jax.random.uniform(k_adj, (B, n_nodes, n_nodes)) < 0.35).astype(jnp.float32)
    adj = jnp.maximum(adj, jnp.eye(n_nodes, dtype=jnp.float32)[None])
    adj_norm = jax.vmap(both_normalized_adjacency)(adj)

    params = make_params(k_par, state_dim, action_dim)

    q = critic_forward(ip, action, adj_norm, params)
    jax.block_until_ready(q)
    assert q.shape == (B,) and q.dtype == jnp.float32

    q_ref = critic_reference(ip, action, adj_norm, params)
    assert jnp.allclose(q, q_ref, rtol=1e-3, atol=1e-4)
    print("KERNEL_OK")
</pallas_src>

<mosaic_0001>
module attributes {stable_mosaic.version = 11 : i64} {
  func.func @_critic_kernel(%arg0: i32, %arg1: memref<1x8x16xf32, #tpu.memory_space<vmem>>, %arg2: memref<1x8x4xf32, #tpu.memory_space<vmem>>, %arg3: memref<1x8x8xf32, #tpu.memory_space<vmem>>, %arg4: memref<72x128xf32, #tpu.memory_space<vmem>>, %arg5: memref<1x1x128xf32, #tpu.memory_space<vmem>>) attributes {dimension_semantics = [#tpu.dimension_semantics<parallel>], iteration_bounds = array<i64: 4>, scalar_prefetch = 0 : i64, scratch_operands = 0 : i64, tpu.core_type = #tpu.core_type<tc>, window_params = [{transform_indices = @transform_0, window_bounds = array<i64: 1, 8, 16>}, {transform_indices = @transform_1, window_bounds = array<i64: 1, 8, 4>}, {transform_indices = @transform_2, window_bounds = array<i64: 1, 8, 8>}, {pipeline_mode = #tpu.pipeline_mode<synchronous>, transform_indices = @transform_3, window_bounds = array<i64: 72, 128>}, {transform_indices = @transform_4, window_bounds = array<i64: 1, 1, 128>}]} {
    %c0 = arith.constant 0 : index
    %c0_0 = arith.constant 0 : index
    %c0_1 = arith.constant 0 : index
    %0 = vector.load %arg1[%c0, %c0_0, %c0_1] : memref<1x8x16xf32, #tpu.memory_space<vmem>>, vector<1x8x16xf32>
    %1 = vector.shape_cast %0 : vector<1x8x16xf32> to vector<8x16xf32>
    %c0_2 = arith.constant 0 : index
    %c0_3 = arith.constant 0 : index
    %c0_4 = arith.constant 0 : index
    %2 = vector.load %arg2[%c0_2, %c0_3, %c0_4] : memref<1x8x4xf32, #tpu.memory_space<vmem>>, vector<1x8x4xf32>
    %3 = vector.shape_cast %2 : vector<1x8x4xf32> to vector<8x4xf32>
    %c0_5 = arith.constant 0 : index
    %c0_6 = arith.constant 0 : index
    %c0_7 = arith.constant 0 : index
    %4 = vector.load %arg3[%c0_5, %c0_6, %c0_7] : memref<1x8x8xf32, #tpu.memory_space<vmem>>, vector<1x8x8xf32>
    %5 = vector.shape_cast %4 : vector<1x8x8xf32> to vector<8x8xf32>
    %c0_8 = arith.constant 0 : index
    %c0_9 = arith.constant 0 : index
    %6 = vector.load %arg4[%c0_8, %c0_9] : memref<72x128xf32, #tpu.memory_space<vmem>>, vector<16x40xf32>
    %c16 = arith.constant 16 : index
    %c0_10 = arith.constant 0 : index
    %7 = vector.load %arg4[%c16, %c0_10] : memref<72x128xf32, #tpu.memory_space<vmem>>, vector<40x24xf32>
    %c56 = arith.constant 56 : index
    %c0_11 = arith.constant 0 : index
    %8 = vector.load %arg4[%c56, %c0_11] : memref<72x128xf32, #tpu.memory_space<vmem>>, vector<4x24xf32>
    %c64 = arith.constant 64 : index
    %c0_12 = arith.constant 0 : index
    %9 = vector.load %arg4[%c64, %c0_12] : memref<72x128xf32, #tpu.memory_space<vmem>>, vector<1x40xf32>
    %c65 = arith.constant 65 : index
    %c0_13 = arith.constant 0 : index
    %10 = vector.load %arg4[%c65, %c0_13] : memref<72x128xf32, #tpu.memory_space<vmem>>, vector<1x40xf32>
    %c66 = arith.constant 66 : index
    %c0_14 = arith.constant 0 : index
    %11 = vector.load %arg4[%c66, %c0_14] : memref<72x128xf32, #tpu.memory_space<vmem>>, vector<1x40xf32>
    %c67 = arith.constant 67 : index
    %c0_15 = arith.constant 0 : index
    %12 = vector.load %arg4[%c67, %c0_15] : memref<72x128xf32, #tpu.memory_space<vmem>>, vector<1x24xf32>
    %c68 = arith.constant 68 : index
    %c0_16 = arith.constant 0 : index
    %13 = vector.load %arg4[%c68, %c0_16] : memref<72x128xf32, #tpu.memory_space<vmem>>, vector<1x24xf32>
    %c69 = arith.constant 69 : index
    %c0_17 = arith.constant 0 : index
    %14 = vector.load %arg4[%c69, %c0_17] : memref<72x128xf32, #tpu.memory_space<vmem>>, vector<1x1xf32>
    %cst = arith.constant dense<0.000000e+00> : vector<8x40xf32>
    %15 = tpu.matmul %1, %6, %cst {dimension_numbers = #tpu.dot_dimension_numbers<[1], [0], [0], [1], [0, 0, 1, 1], [], []>} : vector<8x16xf32>, vector<16x40xf32>, vector<8x40xf32> -> vector<8x40xf32>
    %16 = vector.broadcast %9 : vector<1x40xf32> to vector<8x40xf32>
    %17 = arith.addf %15, %16 : vector<8x40xf32>
    %cst_18 = arith.constant 0.000000e+00 : f32
    %18 = vector.broadcast %cst_18 : f32 to vector<8x40xf32>
    %19 = arith.maximumf %17, %18 : vector<8x40xf32>
    %cst_19 = arith.constant dense<0.000000e+00> : vector<40xf32>
    %20 = vector.multi_reduction <add>, %19, %cst_19 [0] : vector<8x40xf32> to vector<40xf32>
    %21 = vector.shape_cast %20 : vector<40xf32> to vector<1x40xf32>
    %cst_20 = arith.constant 8.000000e+00 : f32
    %22 = vector.broadcast %cst_20 : f32 to vector<1x40xf32>
    %23 = arith.divf %21, %22 : vector<1x40xf32>
    %24 = vector.broadcast %23 : vector<1x40xf32> to vector<8x40xf32>
    %25 = arith.subf %19, %24 : vector<8x40xf32>
    %26 = arith.mulf %25, %25 : vector<8x40xf32>
    %cst_21 = arith.constant dense<0.000000e+00> : vector<40xf32>
    %27 = vector.multi_reduction <add>, %26, %cst_21 [0] : vector<8x40xf32> to vector<40xf32>
    %28 = vector.shape_cast %27 : vector<40xf32> to vector<1x40xf32>
    %cst_22 = arith.constant 8.000000e+00 : f32
    %29 = vector.broadcast %cst_22 : f32 to vector<1x40xf32>
    %30 = arith.divf %28, %29 : vector<1x40xf32>
    %cst_23 = arith.constant 9.99999974E-6 : f32
    %31 = vector.broadcast %cst_23 : f32 to vector<1x40xf32>
    %32 = arith.addf %30, %31 : vector<1x40xf32>
    %33 = math.rsqrt %32 : vector<1x40xf32>
    %34 = arith.mulf %10, %33 : vector<1x40xf32>
    %35 = arith.mulf %23, %34 : vector<1x40xf32>
    %36 = arith.subf %11, %35 : vector<1x40xf32>
    %37 = vector.broadcast %34 : vector<1x40xf32> to vector<8x40xf32>
    %38 = arith.mulf %19, %37 : vector<8x40xf32>
    %39 = vector.broadcast %36 : vector<1x40xf32> to vector<8x40xf32>
    %40 = arith.addf %38, %39 : vector<8x40xf32>
    %cst_24 = arith.constant dense<0.000000e+00> : vector<8x24xf32>
    %41 = tpu.matmul %40, %7, %cst_24 {dimension_numbers = #tpu.dot_dimension_numbers<[1], [0], [0], [1], [0, 0, 1, 1], [], []>} : vector<8x40xf32>, vector<40x24xf32>, vector<8x24xf32> -> vector<8x24xf32>
    %cst_25 = arith.constant dense<0.000000e+00> : vector<8x24xf32>
    %42 = tpu.matmul %5, %41, %cst_25 {dimension_numbers = #tpu.dot_dimension_numbers<[1], [0], [0], [1], [0, 0, 1, 1], [], []>} : vector<8x8xf32>, vector<8x24xf32>, vector<8x24xf32> -> vector<8x24xf32>
    %cst_26 = arith.constant dense<0.000000e+00> : vector<8x24xf32>
    %43 = tpu.matmul %3, %8, %cst_26 {dimension_numbers = #tpu.dot_dimension_numbers<[1], [0], [0], [1], [0, 0, 1, 1], [], []>} : vector<8x4xf32>, vector<4x24xf32>, vector<8x24xf32> -> vector<8x24xf32>
    %44 = arith.addf %42, %43 : vector<8x24xf32>
    %45 = vector.broadcast %12 : vector<1x24xf32> to vector<8x24xf32>
    %46 = arith.addf %44, %45 : vector<8x24xf32>
    %cst_27 = arith.constant 0.000000e+00 : f32
    %47 = vector.broadcast %cst_27 : f32 to vector<8x24xf32>
    %48 = arith.maximumf %46, %47 : vector<8x24xf32>
    %cst_28 = arith.constant dense<0.000000e+00> : vector<8xf32>
    %49 = vector.multi_reduction <add>, %5, %cst_28 [0] : vector<8x8xf32> to vector<8xf32>
    %50 = vector.shape_cast %49 : vector<8xf32> to vector<1x8xf32>
    %cst_29 = arith.constant 8.000000e+00 : f32
    %51 = vector.broadcast %cst_29 : f32 to vector<1x8xf32>
    %52 = arith.divf %50, %51 : vector<1x8xf32>
    %cst_30 = arith.constant dense<0.000000e+00> : vector<1x24xf32>
    %53 = tpu.matmul %52, %48, %cst_30 {dimension_numbers = #tpu.dot_dimension_numbers<[1], [0], [0], [1], [0, 0, 1, 1], [], []>} : vector<1x8xf32>, vector<8x24xf32>, vector<1x24xf32> -> vector<1x24xf32>
    %54 = arith.mulf %53, %13 : vector<1x24xf32>
    %cst_31 = arith.constant dense<0.000000e+00> : vector<1xf32>
    %55 = vector.multi_reduction <add>, %54, %cst_31 [1] : vector<1x24xf32> to vector<1xf32>
    %56 = vector.shape_cast %55 : vector<1xf32> to vector<1x1xf32>
    %57 = arith.addf %56, %14 : vector<1x1xf32>
    %58 = vector.shape_cast %57 : vector<1x1xf32> to vector<1x1xf32>
    %59 = vector.broadcast %58 : vector<1x1xf32> to vector<1x128xf32>
    %c0_32 = arith.constant 0 : index
    %c0_33 = arith.constant 0 : index
    %c0_34 = arith.constant 0 : index
    %60 = vector.load %arg5[%c0_32, %c0_33, %c0_34] : memref<1x1x128xf32, #tpu.memory_space<vmem>>, vector<1x1x128xf32>
    %61 = vector.shape_cast %60 : vector<1x1x128xf32> to vector<1x128xf32>
    %62 = vector.shape_cast %59 : vector<1x128xf32> to vector<1x1x128xf32>
    tpu.vector_store %arg5[%c0_32, %c0_33, %c0_34], %62 {strides = array<i32>} : memref<1x1x128xf32, #tpu.memory_space<vmem>>, vector<1x1x128xf32>,
    return
  }
  func.func @transform_0(%arg0: i32) -> (i32, i32, i32) {
    %c0_i32 = arith.constant 0 : i32
    %c0_i32_0 = arith.constant 0 : i32
    %c0_i32_1 = arith.constant 0 : i32
    return %arg0, %c0_i32, %c0_i32_0 : i32, i32, i32
  }
  func.func @transform_1(%arg0: i32) -> (i32, i32, i32) {
    %c0_i32 = arith.constant 0 : i32
    %c0_i32_0 = arith.constant 0 : i32
    %c0_i32_1 = arith.constant 0 : i32
    return %arg0, %c0_i32, %c0_i32_0 : i32, i32, i32
  }
  func.func @transform_2(%arg0: i32) -> (i32, i32, i32) {
    %c0_i32 = arith.constant 0 : i32
    %c0_i32_0 = arith.constant 0 : i32
    %c0_i32_1 = arith.constant 0 : i32
    return %arg0, %c0_i32, %c0_i32_0 : i32, i32, i32
  }
  func.func @transform_3(%arg0: i32) -> (i32, i32) {
    %c0_i32 = arith.constant 0 : i32
    %c0_i32_0 = arith.constant 0 : i32
    %c0_i32_1 = arith.constant 0 : i32
    return %c0_i32, %c0_i32_0 : i32, i32
  }
  func.func @transform_4(%arg0: i32) -> (i32, i32, i32) {
    %c0_i32 = arith.constant 0 : i32
    %c0_i32_0 = arith.constant 0 : i32
    %c0_i32_1 = arith.constant 0 : i32
    return %arg0, %c0_i32, %c0_i32_0 : i32, i32, i32
  }
}

</mosaic_0001>

<bundles_post_ra>
// kernel: tpu_custom_call.1
= control target key start
LH: loop header
LB: loop body
LE: loop exit
PB: predicated region body
PF: predicated region fallthrough
CT: control target
= control target key end

     0   :  { %9 = vsyncpa [#allocation3], 0  ;;  %s1359_s0 = inlined_call_operand.vmem [shape: f32[4,8,16], index: 0, kind: input, shape index: {}]   ;;  %s1360_s1 = inlined_call_operand.vmem [shape: f32[4,8,4], index: 1, kind: input, shape index: {}]   ;;  %s1361_s2 = inlined_call_operand.hbm [shape: f32[4,8,8], index: 2, kind: input, shape index: {}]   ;;  %s1362_s3 = inlined_call_operand.hbm [shape: f32[72,128], index: 3, kind: input, shape index: {}]   ;;  %s1363_s4 = inlined_call_operand.hbm [shape: f32[4,1,128], index: 4, kind: output, shape index: {}]  }
   0x1   :  { %11 = vsyncpa [#allocation3 + $0x1], 0 }
   0x2   :  { %12 = vsyncpa [#allocation6], 0 }
   0x3   :  { %13 = vsyncpa [#allocation4], 0 }
   0x4   :  { %15 = vsyncpa [#allocation4 + $0x1], 0  ;;  %s1140_s15 = smov 0   ;;  %s1142_s16 = smov 0  }
   0x5   :  { %s1144_s17 = smov 0   ;;  %s1146_s18 = smov 0  }
   0x6 LB: > { %s1161_s19 = sadd.s32 4294967295, %s1104_s18   ;;  %s829_s20 = sadd.s32 4294967294, %s1104_s18   ;;  %s1104_s18 = sphi %s1146_s18, %s1382_s18   ;;  %s1100_s17 = sphi %s1144_s17, %s1381_s17   ;;  %s1096_s16 = sphi %s1142_s16, %s1380_s16   ;;  %s1092_s15 = sphi %s1140_s15, %s1379_s15  }
   0x7   : > { %p93_p0 = scmp.ne.s32.totalorder %s1096_s16, %s1092_s15  ;;  %p1364_p1 = scmp.eq.s32.totalorder %s1161_s19, 0 }
   0x8   : > { %p144_p3 = scmp.eq.s32.totalorder %s829_s20, 3  ;;  %p830_p5 = scmp.ge.s32.totalorder %s1104_s18, 1 }
   0x9   : > { %p1170_p4 = por %p1364_p1, %p93_p0  ;;  %p151_p7 = scmp.lt.s32.totalorder %s1104_s18, 5 }
   0xa   : > { %p1175_p6 = por %p144_p3, %p93_p0  ;;  %s1106_s24 = smov [#allocation5]  }
   0xb   : > { %s1367_s21 = scalar_select %p1170_p4, 1, 0 }
   0xc   : > { %s1368_s22 = scalar_select %p1175_p6, 1, 0 }
   0xd   : > { %p1180_p8 = pnand %p830_p5, %p151_p7  ;;  %s163_s25 = sshll.u32 %s1106_s24, 4  ;;  %s164_s25 = int_to_ptr.vmem [resolvable:$true] %s163_s25 }
   0xe   : > { %s1193_s27 = sadd.s32 1, %s1104_s18   ;;  %s80_s28 = sadd.s32 1, %s1100_s17 }
   0xf   : > { %s1369_s23 = scalar_select %p1180_p8, 1, 0 }
  0x10   : > { %p918_p9 = pneg %p1180_p8  ;;  %s77_s29 = ssub.s32 %s1104_s18, %s1193_s27 }
  0x11   : > { %s976_s6 = scalar_lea.hbm %s1362_s3, 1152 }
  0x12   : > { %p1188_p10 = pnand %p918_p9, %p1364_p1  ;;  %p977_p11 = scmp.ne.s32.totalorder %s1362_s3, %s976_s6 }
  0x13   : > { %p983_p3 = scmp.lt.u32.totalorder %s976_s6, %s1362_s3 }
  0x14   : > { %p978_p12 = pneg %p1188_p10 }
  0x16   : > { %p979_p13 = pnand %p978_p12, %p977_p11 }
  0x18   : > { %p980_p0 = pneg %p979_p13 }
  0x1a   : > { %p985_p5 = pnand %p983_p3, %p980_p0 }
  0x1c   : > { %988 = shalt.err (!%p985_p5)
}
  0x1d   : > { %s989_s11 = scalar_lea.vmem %s164_s25, 1152  ;;  %p997_p2 = scmp.lt.s32.totalorder %s164_s25, %s164_s25 }
  0x1e   : > { %p990_p7 = scmp.ne.s32.totalorder %s164_s25, %s989_s11  ;;  %p998_p6 = scmp.lt.s32.totalorder %s989_s11, %s989_s11 }
  0x20   : > { %p992_p9 = pnand %p990_p7, %p978_p12  ;;  %p999_p4 = por %p998_p6, %p997_p2 }
  0x22   : > { %p993_p1 = pneg %p992_p9 }
  0x24   : > { %p1000_p8 = pnand %p999_p4, %p993_p1 }
  0x26   : > { %1003 = shalt.err (!%p1000_p8)
}
  0x27   : > { %s1107_s12 = smov 128   ;;  %s1108_s13 = smov 8  }
  0x28   : > { %921 = dma.hbm_to_vmem [thread:$0]  (!%p1188_p10), %s1362_s3, 1152, %s164_s25, [#allocation6], %s1107_s12, %s1107_s12, %s1108_s13  }
  0x29   : > { %p78_p11 = scmp.eq.s32.totalorder %s77_s29, 0  ;;  %p87_p2 = scmp.ne.s32.totalorder %s1100_s17, %s1096_s16 }
  0x2a   : > { %p88_p1 = scmp.eq.s32.totalorder %s1104_s18, 0  ;;  %p931_p4 = scmp.lt.s32.totalorder %s1104_s18, 4 }
  0x2b   : > { %s1219_s24 = scalar_select %p78_p11, %s1100_s17, %s80_s28  }
  0x2c   : > { %p89_p6 = por %p88_p1, %p87_p2  ;;  %p1371_p8 = scmp.eq.s32.totalorder %s1161_s19, 3 }
  0x2d   : > { %s191_s5 = sand.u32 1, %s1100_s17   ;;  %s834_s6 = sshll.u32 %s1104_s18, 7 }
  0x2e   : > { %p1223_p12 = por %p1371_p8, %p87_p2  ;;  %s833_s7 = sshll.u32 %s191_s5, 3 }
  0x2f   : > { %s1232_s9 = scalar_lea.hbm %s1361_s2, %s834_s6  ;;  %s195_s25 = scalar_lea.vmem [#allocation2], %s833_s7 }
  0x30   : > { %s202_s28 = sshll.u32 %s195_s25, 4  ;;  %p1234_p10 = pnand %p931_p4, %p89_p6  ;;  %s1238_s28 = int_to_ptr.vmem [resolvable:$true] %s202_s28 }
  0x31   : > { %s192_s10 = scalar_lea.sflag [#allocation3], %s191_s5  ;;  %s1004_s11 = scalar_lea.hbm %s1232_s9, 128 }
  0x32   : > { %p1005_p13 = scmp.ne.s32.totalorder %s1232_s9, %s1004_s11  ;;  %p1006_p0 = pneg %p1234_p10 }
  0x33   : > { %s1009_s14 = scalar_lea.hbm %s1361_s2, 512  ;;  %p1010_p7 = scmp.lt.u32.totalorder %s1232_s9, %s1361_s2 }
  0x34   : > { %p1007_p3 = pnand %p1006_p0, %p1005_p13  ;;  %p1011_p9 = scmp.lt.u32.totalorder %s1009_s14, %s1004_s11 }
  0x35   : > { %p1013_p2 = scmp.lt.u32.totalorder %s1004_s11, %s1232_s9 }
  0x36   : > { %p1008_p5 = pneg %p1007_p3  ;;  %p1012_p11 = por %p1011_p9, %p1010_p7 }
  0x38   : > { %p1014_p1 = por %p1013_p2, %p1012_p11 }
  0x3a   : > { %p1015_p4 = pnand %p1014_p1, %p1008_p5 }
  0x3c   : > { %1018 = shalt.err (!%p1015_p4)
}
  0x3d   : > { %s1019_s5 = scalar_lea.vmem %s1238_s28, 128  ;;  %s1109_s7 = smov [#allocation2]  }
  0x3e   : > { %p1020_p6 = scmp.ne.s32.totalorder %s1238_s28, %s1019_s5  ;;  %s1024_s26 = sshll.u32 %s1109_s7, 4  ;;  %s1025_s26 = int_to_ptr.vmem [resolvable:$false] %s1024_s26 }
  0x3f   : > { %s1026_s8 = scalar_lea.vmem %s1025_s26, 256  ;;  %p1027_p3 = scmp.lt.s32.totalorder %s1238_s28, %s1025_s26 }
  0x40   : > { %p1022_p8 = pnand %p1020_p6, %p1006_p0  ;;  %p1028_p7 = scmp.lt.s32.totalorder %s1026_s8, %s1019_s5 }
  0x42   : > { %p1023_p13 = pneg %p1022_p8  ;;  %p1029_p9 = por %p1028_p7, %p1027_p3 }
  0x44   : > { %p1030_p11 = pnand %p1029_p9, %p1023_p13 }
  0x46   : > { %1033 = shalt.err (!%p1030_p11)
}
  0x47   : > { %925 = dma.hbm_to_vmem [thread:$0]  (!%p1234_p10), %s1232_s9, 128, %s1238_s28, %s192_s10  }
  0x48   : > { %p1374_p5 = scmp.ne.s32.totalorder %s1369_s23, 0 }
  0x49   : > { %s1268_s25 = sand.u32 (!%p1374_p5), 1, %s1096_s16   ;;  %p1375_p0 = scmp.ne.s32.totalorder (!%p1374_p5), %s1367_s21, 0 }
  0x4a   : > { %211 = sbr.rel (%p1374_p5) target bundleno = 1298 (0x512), region = 36  ;;  %s836_s11 = sshll.u32 (!%p1374_p5), %s1268_s25, 3 }
  0x4b   : > { %s214_s12 = scalar_lea.sflag (!%p1374_p5), [#allocation3], %s1268_s25  ;;  %s1272_s13 = scalar_lea.vmem (!%p1374_p5), [#allocation2], %s836_s11 }
  0x51   : > { %1079 = dma.done.wait (%p1375_p0), %s214_s12, 128  }
  0x52   : > { %1081 = vsyncadd (%p1375_p0), %s214_s12, 4294967168  ;;  %p1376_p10 = scmp.eq.s32.totalorder %s1161_s19, 0 }
  0x54   : > { %1083 = dma.done.wait (%p1376_p10), [#allocation6], 1152   ;;  %p1377_p2 = pmov %p1376_p10 }
  0x55   : > { %p253_p1 = scmp.lt.s32.totalorder %s1161_s19, 3  ;;  %v1110_v0 = vmov 0.0|0.0   ;;  %vm1111_vm0 = vmmov 0   ;;  %v1112_v1 = vmov 0.0   ;;  %v264_v2 = vld [vmem:[#allocation5] sm:$0xff]  ;;  %v265_v3 = vld [vmem:[#allocation5 + $0x8] sm:$0xff]  ;;  %v382_v39 = vlaneseq }
  0x56   : > { %1085 = vsyncadd (%p1377_p2), [#allocation6], 4294966144  ;;  %901 = vmatprep.subr.bf16.mxu0 %v1110_v0  ;;  %870 = vmatprep.mubr.msk.f32.mxu0 %vm1111_vm0, %v1112_v1  ;;  %v902_v4 = vpack.c.bf16 %v265_v3, %v264_v2  ;;  %vm282_vm1 = vcmask 130048   ;;  %v266_v6 = vld [vmem:[#allocation5 + $0x10] sm:$0xff]  ;;  %v267_v7 = vld [vmem:[#allocation5 + $0x18] sm:$0xff]  ;;  %vm469_vm2 = vcmask 1043456  }
  0x57   : > { %s254_s23 = scalar_select %p253_p1, %s1161_s19, 3  ;;  %904 = vmatprep.subr.bf16.mxu1 %v1110_v0  ;;  %883 = vmatprep.mubr.msk.f32.mxu1 %vm1111_vm0, %v1112_v1  ;;  %v268_v8 = vld [vmem:[#allocation5 + $0x20] sm:$0xff]  ;;  %v905_v9 = vpack.c.bf16 %v267_v7, %v266_v6  ;;  %v269_v10 = vld [vmem:[#allocation5 + $0x28] sm:$0xff]  ;;  %v270_v12 = vld [vmem:[#allocation5 + $0x30] sm:$0xff]  ;;  %vm465_vm3 = vcmask 31744   ;;  %vm357_vm4 = vcmask 326656  }
  0x58   : > { %903 = vmatpush3.bf16.msra.mxu0 %v902_v4  ;;  %v908_v11 = vpack.c.bf16 %v269_v10, %v268_v8  ;;  %v271_v13 = vld [vmem:[#allocation5 + $0x38] sm:$0xf]  ;;  %v840_v15 = vld [vmem:[#allocation5 + $0x40] ss:$0 sm:$0xff]  ;;  %v383_v40 = vshrl.u32 %v382_v39, 7  ;;  %vm543_vm5 = vcmask 64512  }
  0x59   : > { %s838_s21 = sshll.u32 %s254_s23, 3  ;;  %886 = vmatprep.subr.mxu0 %v1112_v1  ;;  %906 = vmatpush3.bf16.msra.mxu1 %v905_v9  ;;  %v273_v41 = vld [vmem:[#allocation5 + $0x41] sm:$0x1]  ;;  %v274_v45 = vld [vmem:[#allocation5 + $0x42] sm:$0x1]  ;;  %v263_v54 = vld [vmem:[%s1272_s13] sm:$0xff] }
  0x5a   : > { %s256_s29 = scalar_lea.vmem %s1359_s0, %s838_s21  ;;  %907 = vmatprep.subr.bf16.mxu1 %v1110_v0  ;;  %s260_s20 = scalar_lea.vmem %s1360_s1, %s838_s21  ;;  %v384_v42 = vsub.s32 0, %v383_v40  ;;  %v623_v57 = vsel %vm543_vm5, %v263_v54, 0.0  ;;  %v846_v0 = vld [vmem:[#allocation5 + $0x43] ss:$0 sm:$0xff]  ;;  %v276_v7 = vld [vmem:[#allocation5 + $0x44] sm:$0x1] }
  0x5b   : > { %v261_v5 = vld [vmem:[%s256_s29] sm:$0xff]  ;;  %v624_v58 = vrot.slane %v623_v57, 4  ;;  %vm705_vm6 = vcmask 188416   ;;  %s252_s6 = scalar_lea.vmem [#allocation7], %s1268_s25  ;;  %s848_s7 = sshll.u32 %s1161_s19, 4 }
  0x5c   : > { %871 = vmatmul.mubr.msk.f32.vlgmr.msra.gmra.mrb[0].mxu0 %vm282_vm1, %v261_v5  ;;  %v262_v14 = vld [vmem:[%s260_s20] sm:$0xff]  ;;  %s729_s5 = sshll.u32 %s252_s6, 4  ;;  %s1318_s11 = scalar_lea.hbm %s1363_s4, %s848_s7  ;;  %s1313_s5 = int_to_ptr.vmem [resolvable:$true] %s729_s5 }
  0x5d   : > { %888 = vmatprep.mubr.msk.f32.mxu0 %vm1111_vm0, %v1112_v1  ;;  %909 = vmatpush3.bf16.msra.mxu1 %v908_v11  ;;  %v625_v59 = vadd.f32 %v624_v58, %v623_v57  ;;  %s717_s12 = scalar_lea.sflag [#allocation4], %s1268_s25  ;;  %s1034_s13 = scalar_lea.vmem %s1313_s5, 16 }
  0x5e   : > { %881 = vmatprep.subr.mxu1 %v1112_v1  ;;  %887 = vmatpush3.msk.msra.mxu0 %vm469_vm2, %v271_v13  ;;  %v277_v13 = vld [vmem:[#allocation5 + $0x45] sm:$0x1]  ;;  %p1035_p4 = scmp.ne.s32.totalorder %s1313_s5, %s1034_s13  ;;  %s1114_s23 = smov [#allocation7]  }
  0x5f   : > { %891 = vmatprep.subr.mxu0 %v1112_v1  ;;  %v626_v60 = vrot.slane %v625_v59, 2  ;;  %s1038_s19 = sshll.u32 %s1114_s23, 4  ;;  %s1039_s19 = int_to_ptr.vmem [resolvable:$false] %s1038_s19 }
  0x60   : > { %889 = vmatmul.mubr.msk.f32.vlgmr.msra.gmra.mrb[2].mxu0 %vm465_vm3, %v262_v14  ;;  %p1036_p6 = pnand %p1035_p4, %p1223_p12  ;;  %s1040_s21 = scalar_lea.vmem %s1039_s19, 32 }
  0x61   : > { %882 = vmatpush3.msra.mxu1 %v270_v12  ;;  %893 = vmatprep.mubr.msk.f32.mxu0 %vm1111_vm0, %v1112_v1  ;;  %v627_v61 = vadd.f32 %v626_v60, %v625_v59  ;;  %v1113_v12 = vmov 0   ;;  %p1041_p13 = scmp.lt.s32.totalorder %s1313_s5, %s1039_s19  ;;  %p1042_p3 = scmp.lt.s32.totalorder %s1040_s21, %s1034_s13 }
  0x62   : > { %896 = vmatprep.subr.mxu1 %v1112_v1  ;;  %973 = vset.pattern.permute.xlu0 %v1113_v12  ;;  %p1037_p8 = pneg %p1036_p6 }
  0x63   : > { %v628_v62 = vrot.slane %v627_v61, 1  ;;  %p1043_p7 = por %p1042_p3, %p1041_p13 }
  0x65   : > { %v629_v63 = vadd.f32 %v628_v62, %v627_v61  ;;  %p1044_p9 = pnand %p1043_p7, %p1037_p8 }
  0x67   : > { %v630_v5 = vmul.f32 0.125, %v629_v63 }
 0x12f   : > { %v352_v16 = vpop.f32.mrb[0].mxu0 }
 0x130   : > { %v353_v17 = vadd.f32 %v840_v15, %v352_v16  ;;  %v872_v18 = vpop.f32.mrb[1].mxu0 }
 0x132   : > { %v356_v19 = vmax.f32 %v353_v17, 0.0 }
 0x133   : > { %v539_v52 = vpop.f32.mrb[2].mxu0 }
 0x134   : > { %v358_v20 = vsel %vm357_vm4, %v356_v19, 0.0  ;;  %v890_v53 = vpop.f32.mrb[3].mxu0 }
 0x135   : > { %v359_v21 = vrot.slane %v358_v20, 4 }
 0x137   : > { %v360_v22 = vadd.f32 %v359_v21, %v358_v20 }
 0x139   : > { %v361_v23 = vrot.slane %v360_v22, 2 }
 0x13b   : > { %v362_v24 = vadd.f32 %v361_v23, %v360_v22 }
 0x13d   : > { %v363_v25 = vrot.slane %v362_v24, 1 }
 0x13f   : > { %v364_v26 = vadd.f32 %v363_v25, %v362_v24 }
 0x141   : > { %v366_v27 = vmul.f32 0.125, %v364_v26 }
 0x143   : > { %v367_v28 = vsub.f32 %v356_v19, %v366_v27 }
 0x145   : > { %v368_v29 = vmul.f32 %v367_v28, %v367_v28 }
 0x147   : > { %v369_v30 = vsel %vm357_vm4, %v368_v29, 0.0 }
 0x148   : > { %v370_v31 = vrot.slane %v369_v30, 4 }
 0x14a   : > { %v371_v32 = vadd.f32 %v370_v31, %v369_v30 }
 0x14c   : > { %v372_v33 = vrot.slane %v371_v32, 2 }
 0x14e   : > { %v373_v34 = vadd.f32 %v372_v33, %v371_v32 }
 0x150   : > { %v374_v35 = vrot.slane %v373_v34, 1 }
 0x152   : > { %v375_v36 = vadd.f32 %v374_v35, %v373_v34 }
 0x154   : > { %v376_v37 = vmul.f32 0.125, %v375_v36 }
 0x156   : > { %v377_v38 = vadd.f32 1e-05, %v376_v37 }
 0x158   : > { %974 = vrsqrt.f32 %v377_v38 }
 0x162   : > { %v975_v43 = vpop.eup %974 }
 0x163   : > { %v379_v44 = vmul.f32 %v975_v43, %v273_v41 }
 0x165   : > { %v380_v46 = vmul.f32 %v379_v44, %v366_v27  ;;  %v385_v47 = vrot.slane %v379_v44, %v384_v42 }
 0x167   : > { %v381_v48 = vsub.f32 %v274_v45, %v380_v46  ;;  %v386_v49 = vmul.f32 %v385_v47, %v356_v19 }
 0x169   : > { %v390_v50 = vrot.slane %v381_v48, %v384_v42 }
 0x16b   : > { %v391_v51 = vadd.f32 %v390_v50, %v386_v49 }
 0x16d   : > { %884 = vmatmul.mubr.msk.f32.vlgmr.msra.gmra.mrb[0].mxu1 %vm357_vm4, %v391_v51 }
 0x16e   : > { %898 = vmatprep.mubr.msk.f32.mxu1 %vm1111_vm0, %v1112_v1 }
 0x240   : > { %v461_v55 = vpop.f32.mrb[0].mxu1 }
 0x241   : > { %v885_v56 = vpop.f32.mrb[1].mxu1  ;;  %892 = vmatpush3.msra.mxu0 %v461_v55 }
 0x242   : > { %894 = vmatmul.mubr.msk.f32.vlgmr.msra.gmra.mrb[4].mxu0 %vm543_vm5, %v263_v54 }
 0x315   : > { %v613_v2 = vpop.f32.mrb[4].mxu0 }
 0x316   : > { %v614_v1 = vadd.f32 %v613_v2, %v539_v52  ;;  %v895_v3 = vpop.f32.mrb[5].mxu0 }
 0x318   : > { %v621_v4 = vadd.f32 %v846_v0, %v614_v1 }
 0x31a   : > { %v622_v6 = vmax.f32 %v621_v4, 0.0 }
 0x31c   : > { %897 = vmatpush3.msra.mxu1 %v622_v6 }
 0x31d   : > { %899 = vmatmul.mubr.msk.f32.vlgmr.msra.gmra.mrb[2].mxu1 %vm543_vm5, %v630_v5 }
 0x3f0   : > { %v700_v8 = vpop.f32.mrb[2].mxu1 }
 0x3f1   : > { %v704_v9 = vmul.f32 %v700_v8, %v276_v7  ;;  %v900_v10 = vpop.f32.mrb[3].mxu1 }
 0x3f3   : > { %v706_v11 = vsel %vm705_vm6, %v704_v9, 0.0 }
 0x3f4   : > { %707 = vadd.xlane.f32.xlu0 %v706_v11 }
 0x481   : > { %v708_v14 = vpop.xlane.xlu0 %707 }
 0x482   : > { %v709_v15 = vadd.f32 %v708_v14, %v277_v13 }
 0x484   : > { %712 = vperm.xlu0 %973, %v709_v15  }
 0x503   : > { %v713_v16 = vpop.permute.xlu0 %712 }
 0x504   : > { %715 = vst [vmem:[%s252_s6] sm:$0x1] %v713_v16 }
 0x505   : > { %1047 = shalt.err (!%p1044_p9)
}
 0x506   : > { %s1048_s25 = scalar_lea.hbm %s1318_s11, 16  ;;  %s1052_s29 = scalar_lea.hbm %s1363_s4, 64 }
 0x507   : > { %p1049_p11 = scmp.ne.s32.totalorder %s1318_s11, %s1048_s25  ;;  %p1053_p10 = scmp.lt.u32.totalorder %s1318_s11, %s1363_s4 }
 0x508   : > { %p1054_p2 = scmp.lt.u32.totalorder %s1052_s29, %s1048_s25  ;;  %p1056_p4 = scmp.lt.u32.totalorder %s1048_s25, %s1318_s11 }
 0x509   : > { %p1050_p5 = pnand %p1049_p11, %p1223_p12 }
 0x50a   : > { %p1055_p1 = por %p1054_p2, %p1053_p10 }
 0x50b   : > { %p1051_p0 = pneg %p1050_p5 }
 0x50c   : > { %p1057_p6 = por %p1056_p4, %p1055_p1 }
 0x50e   : > { %p1058_p8 = pnand %p1057_p6, %p1051_p0 }
 0x510   : > { %1061 = shalt.err (!%p1058_p8)
}
 0x511   : > { %916 = dma.vmem_to_hbm [thread:$0]  (%p1223_p12), %s1313_s5, 16, %s1318_s11, %s717_s12  }
 0x512 PF: > { %p933_p13 = scmp.ge.s32.totalorder %s1104_s18, 2  ;;  %s741_s20 = sand.u32 1, %s1092_s15  }
 0x513   : > { %p1378_p3 = scmp.ne.s32.totalorder %s1368_s22, 0  ;;  %s742_s6 = scalar_lea.sflag [#allocation4], %s741_s20 }
 0x515   : > { %p927_p7 = pnand %p933_p13, %p1378_p3 }
 0x517   : > { %1087 = dma.done.wait (!%p927_p7), %s742_s6, 16  }
 0x518   : > { %1089 = vsyncadd (!%p927_p7), %s742_s6, 4294967280  ;;  %p18_p9 = scmp.ge.s32.totalorder %s1193_s27, 6   ;;  %s1379_s15 = smov %s1096_s16 }
 0x519   : > { %s1380_s16 = smov %s1100_s17  ;;  %s1381_s17 = smov %s1219_s24 }
 0x51a   : > { %s1382_s18 = smov %s1193_s27  ;;  %20 = sbr.rel (!%p18_p9) target bundleno = 6 (0x6), region = 91 }
 0x521   :  { %746 = vsyncpa [#allocation3], 1 }
 0x522   :  { %748 = vsyncpa [#allocation3 + $0x1], 1 }
 0x523   :  { %749 = vsyncpa [#allocation6], 1 }
 0x524   :  { %750 = vsyncpa [#allocation4], 1 }
 0x525   :  { %752 = vsyncpa [#allocation4 + $0x1], 1 }

</bundles_post_ra>
